<compile_context>
chip_gen: v7x
topology: tpu7x:2x2x1
jax: 0.10.0
libtpu: 0.0.40
codegen_flags: <defaults>
</compile_context>

<pallas_src>
import jax
import jax.numpy as jnp
from jax.experimental import pallas as pl
from jax.experimental.pallas import tpu as pltpu


def _round_up(x, m):
    return ((x + m - 1) // m) * m


def _vmem_budget_bytes():
    """Chip-aware usable-VMEM budget (v5e/v6e: 128 MiB, v7x: 64 MiB physical)."""
    cap = 64 << 20
    try:
        info = pltpu.get_tpu_info()
        cap = int(getattr(info, "vmem_capacity_bytes", cap)) or cap
    except Exception:
        pass
    # Leave headroom for compiler-internal scratch; never exceed ~96 MiB.
    return min((cap * 3) // 4, 96 << 20)


# ---------------------------------------------------------------------------
# Kernels
# ---------------------------------------------------------------------------

def _mlp_kernel_fused(x_ref, w1_ref, b1_ref, w2_ref, b2_ref, o_ref):
    """Single-pass: out = relu(x @ W1 + b1) @ W2 + b2 (whole K in one block)."""
    # Dropout(0.2) in eval mode == identity.
    xb = x_ref[...].astype(jnp.bfloat16)                       # in-kernel cast
    h = jnp.dot(xb, w1_ref[...], preferred_element_type=jnp.float32)
    h = jnp.maximum(h + b1_ref[...], 0.0)
    o = jnp.dot(h.astype(jnp.bfloat16), w2_ref[...],
                preferred_element_type=jnp.float32) + b2_ref[...]
    o_ref[...] = o.astype(o_ref.dtype)


def _mlp_kernel_ktiled(x_ref, w1_ref, b1_ref, w2_ref, b2_ref, o_ref, acc_ref):
    """K-tiled fallback for large feature_dim: f32 accumulator over K chunks."""
    k = pl.program_id(1)

    @pl.when(k == 0)
    def _():
        acc_ref[...] = jnp.zeros_like(acc_ref)

    acc_ref[...] += jnp.dot(
        x_ref[...].astype(jnp.bfloat16), w1_ref[...],
        preferred_element_type=jnp.float32,
    )

    @pl.when(k == pl.num_programs(1) - 1)
    def _():
        h = jnp.maximum(acc_ref[...] + b1_ref[...], 0.0)
        o = jnp.dot(h.astype(jnp.bfloat16), w2_ref[...],
                    preferred_element_type=jnp.float32) + b2_ref[...]
        o_ref[...] = o.astype(o_ref.dtype)


# ---------------------------------------------------------------------------
# Builder: static prep (weight cast/pad, tile selection) done ONCE
# ---------------------------------------------------------------------------

def build_mlp(w1, b1, w2, b2):
    """Returns forward(x_nchw) -> (B, latent_dim) f32."""
    K, H = w1.shape
    L = w2.shape[1]
    assert w2.shape[0] == H and b1.shape == (H,) and b2.shape == (L,)

    H_pad = _round_up(H, 128)
    L_pad = _round_up(L, 128)
    K128 = _round_up(K, 128)

    budget = _vmem_budget_bytes()
    TB_budget = 256  # conservative batch tile assumed when sizing K tiles

    def _fits(tk, with_acc):
        use = (2 * TB_budget * tk * 4          # x tiles, f32, double-buffered
               + 2 * tk * H_pad * 2            # W1 chunks, bf16, double-buffered
               + 2 * H_pad * L_pad * 2         # W2, bf16
               + 2 * (H_pad + L_pad) * 4       # biases
               + 2 * TB_budget * L_pad * 4)    # out tiles, f32
        if with_acc:
            use += TB_budget * H_pad * 4       # f32 accumulator scratch
        return use <= budget

    if _fits(K128, with_acc=False):
        TK = K_pad = K128                      # single pass, no K reduction
    else:
        TK = 128
        for cand in (4096, 2048, 1024, 512, 256):
            if cand < K128 and _fits(cand, with_acc=True):
                TK = cand
                break
        K_pad = _round_up(K128, TK)
    nk = K_pad // TK

    # Weights cast to bf16 / zero-padded ONCE (outside the hot path).
    w1_p = jnp.zeros((K_pad, H_pad), jnp.bfloat16).at[:K, :H].set(
        w1.astype(jnp.bfloat16))
    w2_p = jnp.zeros((H_pad, L_pad), jnp.bfloat16).at[:H, :L].set(
        w2.astype(jnp.bfloat16))
    b1_p = jnp.zeros((1, H_pad), jnp.float32).at[0, :H].set(b1.astype(jnp.float32))
    b2_p = jnp.zeros((1, L_pad), jnp.float32).at[0, :L].set(b2.astype(jnp.float32))

    vmem_limit = int(budget)

    def forward(x_nchw):
        B = x_nchw.shape[0]
        emb = x_nchw.reshape(B, -1).astype(jnp.float32)   # Extractor: flatten
        assert emb.shape[1] == K, "feature_dim mismatch"

        # Batch tile: >=16 sublanes (bf16 packing); nb >= 2 whenever B >= 128
        # so both v7x TensorCores get work on the "parallel" batch axis.
        if B >= 512:
            TB = 256
        elif B >= 256:
            TB = 128
        elif B >= 128:
            TB = 64
        else:
            TB = _round_up(max(B, 16), 16)
        B_pad = _round_up(B, TB)
        nb = B_pad // TB

        # Only cheap zero-padding per call; x stays f32 (cast in-kernel).
        if B_pad != B or K_pad != K:
            emb_in = jnp.zeros((B_pad, K_pad), jnp.float32).at[:B, :K].set(emb)
        else:
            emb_in = emb

        cost = pl.CostEstimate(
            flops=2 * B_pad * K_pad * H_pad + 2 * B_pad * H_pad * L_pad,
            transcendentals=0,
            bytes_accessed=(B_pad * K_pad * 4 + w1_p.size * 2 + w2_p.size * 2
                            + (H_pad + L_pad) * 4 + B_pad * L_pad * 4),
        )
        out_shape = jax.ShapeDtypeStruct((B_pad, L_pad), jnp.float32)

        if nk == 1:
            out = pl.pallas_call(
                _mlp_kernel_fused,
                out_shape=out_shape,
                grid_spec=pltpu.PrefetchScalarGridSpec(
                    num_scalar_prefetch=0,
                    grid=(nb,),
                    in_specs=[
                        pl.BlockSpec((TB, K_pad), lambda i: (i, 0)),       # x
                        pl.BlockSpec((K_pad, H_pad), lambda i: (0, 0)),    # W1
                        pl.BlockSpec((1, H_pad), lambda i: (0, 0)),        # b1
                        pl.BlockSpec((H_pad, L_pad), lambda i: (0, 0)),    # W2
                        pl.BlockSpec((1, L_pad), lambda i: (0, 0)),        # b2
                    ],
                    out_specs=pl.BlockSpec((TB, L_pad), lambda i: (i, 0)),
                ),
                compiler_params=pltpu.CompilerParams(
                    dimension_semantics=("parallel",),
                    vmem_limit_bytes=vmem_limit,
                ),
                cost_estimate=cost,
            )(emb_in, w1_p, b1_p, w2_p, b2_p)
        else:
            out = pl.pallas_call(
                _mlp_kernel_ktiled,
                out_shape=out_shape,
                grid_spec=pltpu.PrefetchScalarGridSpec(
                    num_scalar_prefetch=0,
                    grid=(nb, nk),
                    in_specs=[
                        pl.BlockSpec((TB, TK), lambda i, k: (i, k)),       # x
                        pl.BlockSpec((TK, H_pad), lambda i, k: (k, 0)),    # W1
                        pl.BlockSpec((1, H_pad), lambda i, k: (0, 0)),     # b1
                        pl.BlockSpec((H_pad, L_pad), lambda i, k: (0, 0)), # W2
                        pl.BlockSpec((1, L_pad), lambda i, k: (0, 0)),     # b2
                    ],
                    out_specs=pl.BlockSpec((TB, L_pad), lambda i, k: (i, 0)),
                    scratch_shapes=[pltpu.VMEM((TB, H_pad), jnp.float32)],
                ),
                compiler_params=pltpu.CompilerParams(
                    dimension_semantics=("parallel", "arbitrary"),
                    vmem_limit_bytes=vmem_limit,
                ),
                cost_estimate=cost,
            )(emb_in, w1_p, b1_p, w2_p, b2_p)

        return out[:B, :L]

    return forward


# ---------------------------------------------------------------------------
# Params + demo
# ---------------------------------------------------------------------------

def init_params(key, feature_dim, latent_dim=128):
    """nn.Linear-style init (uniform +-1/sqrt(fan_in)); shrink=True branch."""
    hidden_dim = feature_dim // 2
    k1, k2, k3, k4 = jax.random.split(key, 4)
    lim1 = 1.0 / jnp.sqrt(feature_dim)
    lim2 = 1.0 / jnp.sqrt(hidden_dim)
    w1 = jax.random.uniform(k1, (feature_dim, hidden_dim), jnp.float32, -lim1, lim1)
    b1 = jax.random.uniform(k2, (hidden_dim,), jnp.float32, -lim1, lim1)
    w2 = jax.random.uniform(k3, (hidden_dim, latent_dim), jnp.float32, -lim2, lim2)
    b2 = jax.random.uniform(k4, (latent_dim,), jnp.float32, -lim2, lim2)
    return w1, b1, w2, b2


if __name__ == "__main__":
    key = jax.random.PRNGKey(0)
    kx, kp = jax.random.split(key)

    # Small NCHW input: B=2, C=4, H=W=16  ->  feature_dim = 4*16*16 = 1024
    B, C, H, W = 2, 4, 16, 16
    feature_dim = C * H * W
    latent_dim = 128

    x = jax.random.normal(kx, (B, C, H, W), jnp.float32)
    w1, b1, w2, b2 = init_params(kp, feature_dim, latent_dim)

    mlp = build_mlp(w1, b1, w2, b2)
    out = jax.block_until_ready(mlp(x))

    # Pure-JAX reference with the same bf16-input / f32-accumulate semantics.
    emb = x.reshape(B, feature_dim)
    emb32 = emb.astype(jnp.bfloat16).astype(jnp.float32)
    w1_32 = w1.astype(jnp.bfloat16).astype(jnp.float32)
    w2_32 = w2.astype(jnp.bfloat16).astype(jnp.float32)
    h_ref = jnp.maximum(emb32 @ w1_32 + b1, 0.0)
    ref = h_ref.astype(jnp.bfloat16).astype(jnp.float32) @ w2_32 + b2

    assert out.shape == (B, latent_dim)
    assert jnp.allclose(out, ref, atol=2e-2, rtol=2e-2)

    print("KERNEL_OK")
</pallas_src>

<mosaic_0001>
module attributes {stable_mosaic.version = 11 : i64} {
  func.func @_mlp_kernel_fused(%arg0: i32, %arg1: memref<16x1024xf32, #tpu.memory_space<vmem>>, %arg2: memref<1024x512xbf16, #tpu.memory_space<vmem>>, %arg3: memref<1x512xf32, #tpu.memory_space<vmem>>, %arg4: memref<512x128xbf16, #tpu.memory_space<vmem>>, %arg5: memref<1x128xf32, #tpu.memory_space<vmem>>, %arg6: memref<16x128xf32, #tpu.memory_space<vmem>>) attributes {dimension_semantics = [#tpu.dimension_semantics<parallel>], iteration_bounds = array<i64: 1>, scalar_prefetch = 0 : i64, scratch_operands = 0 : i64, tpu.core_type = #tpu.core_type<tc>, window_params = [{transform_indices = @transform_0, window_bounds = array<i64: 16, 1024>}, {pipeline_mode = #tpu.pipeline_mode<synchronous>, transform_indices = @transform_1, window_bounds = array<i64: 1024, 512>}, {pipeline_mode = #tpu.pipeline_mode<synchronous>, transform_indices = @transform_2, window_bounds = array<i64: 1, 512>}, {pipeline_mode = #tpu.pipeline_mode<synchronous>, transform_indices = @transform_3, window_bounds = array<i64: 512, 128>}, {pipeline_mode = #tpu.pipeline_mode<synchronous>, transform_indices = @transform_4, window_bounds = array<i64: 1, 128>}, {transform_indices = @transform_5, window_bounds = array<i64: 16, 128>}]} {
    %c0 = arith.constant 0 : index
    %c0_0 = arith.constant 0 : index
    %0 = vector.load %arg1[%c0, %c0_0] : memref<16x1024xf32, #tpu.memory_space<vmem>>, vector<16x1024xf32>
    %1 = arith.truncf %0 : vector<16x1024xf32> to vector<16x1024xbf16>
    %c0_1 = arith.constant 0 : index
    %c0_2 = arith.constant 0 : index
    %2 = vector.load %arg2[%c0_1, %c0_2] : memref<1024x512xbf16, #tpu.memory_space<vmem>>, vector<1024x512xbf16>
    %cst = arith.constant dense<0.000000e+00> : vector<16x512xf32>
    %3 = tpu.matmul %1, %2, %cst {dimension_numbers = #tpu.dot_dimension_numbers<[1], [0], [0], [1], [0, 0, 1, 1], [], []>} : vector<16x1024xbf16>, vector<1024x512xbf16>, vector<16x512xf32> -> vector<16x512xf32>
    %c0_3 = arith.constant 0 : index
    %c0_4 = arith.constant 0 : index
    %4 = vector.load %arg3[%c0_3, %c0_4] : memref<1x512xf32, #tpu.memory_space<vmem>>, vector<1x512xf32>
    %5 = vector.broadcast %4 : vector<1x512xf32> to vector<16x512xf32>
    %6 = arith.addf %3, %5 : vector<16x512xf32>
    %cst_5 = arith.constant 0.000000e+00 : f32
    %7 = vector.broadcast %cst_5 : f32 to vector<16x512xf32>
    %8 = arith.maximumf %6, %7 : vector<16x512xf32>
    %9 = arith.truncf %8 : vector<16x512xf32> to vector<16x512xbf16>
    %c0_6 = arith.constant 0 : index
    %c0_7 = arith.constant 0 : index
    %10 = vector.load %arg4[%c0_6, %c0_7] : memref<512x128xbf16, #tpu.memory_space<vmem>>, vector<512x128xbf16>
    %cst_8 = arith.constant dense<0.000000e+00> : vector<16x128xf32>
    %11 = tpu.matmul %9, %10, %cst_8 {dimension_numbers = #tpu.dot_dimension_numbers<[1], [0], [0], [1], [0, 0, 1, 1], [], []>} : vector<16x512xbf16>, vector<512x128xbf16>, vector<16x128xf32> -> vector<16x128xf32>
    %c0_9 = arith.constant 0 : index
    %c0_10 = arith.constant 0 : index
    %12 = vector.load %arg5[%c0_9, %c0_10] : memref<1x128xf32, #tpu.memory_space<vmem>>, vector<1x128xf32>
    %13 = vector.broadcast %12 : vector<1x128xf32> to vector<16x128xf32>
    %14 = arith.addf %11, %13 : vector<16x128xf32>
    %c0_11 = arith.constant 0 : index
    %c0_12 = arith.constant 0 : index
    %15 = vector.load %arg6[%c0_11, %c0_12] : memref<16x128xf32, #tpu.memory_space<vmem>>, vector<16x128xf32>
    tpu.vector_store %arg6[%c0_11, %c0_12], %14 {strides = array<i32>} : memref<16x128xf32, #tpu.memory_space<vmem>>, vector<16x128xf32>,
    return
  }
  func.func @transform_0(%arg0: i32) -> (i32, i32) {
    %c0_i32 = arith.constant 0 : i32
    %c0_i32_0 = arith.constant 0 : i32
    return %arg0, %c0_i32 : i32, i32
  }
  func.func @transform_1(%arg0: i32) -> (i32, i32) {
    %c0_i32 = arith.constant 0 : i32
    %c0_i32_0 = arith.constant 0 : i32
    %c0_i32_1 = arith.constant 0 : i32
    return %c0_i32, %c0_i32_0 : i32, i32
  }
  func.func @transform_2(%arg0: i32) -> (i32, i32) {
    %c0_i32 = arith.constant 0 : i32
    %c0_i32_0 = arith.constant 0 : i32
    %c0_i32_1 = arith.constant 0 : i32
    return %c0_i32, %c0_i32_0 : i32, i32
  }
  func.func @transform_3(%arg0: i32) -> (i32, i32) {
    %c0_i32 = arith.constant 0 : i32
    %c0_i32_0 = arith.constant 0 : i32
    %c0_i32_1 = arith.constant 0 : i32
    return %c0_i32, %c0_i32_0 : i32, i32
  }
  func.func @transform_4(%arg0: i32) -> (i32, i32) {
    %c0_i32 = arith.constant 0 : i32
    %c0_i32_0 = arith.constant 0 : i32
    %c0_i32_1 = arith.constant 0 : i32
    return %c0_i32, %c0_i32_0 : i32, i32
  }
  func.func @transform_5(%arg0: i32) -> (i32, i32) {
    %c0_i32 = arith.constant 0 : i32
    %c0_i32_0 = arith.constant 0 : i32
    return %arg0, %c0_i32 : i32, i32
  }
}

</mosaic_0001>

<bundles_post_ra>
// kernel: tpu_custom_call.1
= control target key start
LH: loop header
LB: loop body
LE: loop exit
PB: predicated region body
PF: predicated region fallthrough
CT: control target
= control target key end

     0   :  { %10 = vsyncpa [#allocation3], 0  ;;  %s3347_s0 = inlined_call_operand.hbm [shape: f32[16,1024], index: 0, kind: input, shape index: {}]   ;;  %s3348_s1 = inlined_call_operand.hbm [shape: bf16[1024,512], index: 1, kind: input, shape index: {}]   ;;  %s3349_s2 = inlined_call_operand.vmem [shape: f32[1,512], index: 2, kind: input, shape index: {}]   ;;  %s3350_s3 = inlined_call_operand.hbm [shape: bf16[512,128], index: 3, kind: input, shape index: {}]   ;;  %s3351_s4 = inlined_call_operand.vmem [shape: f32[1,128], index: 4, kind: input, shape index: {}]   ;;  %s3352_s5 = inlined_call_operand.hbm [shape: f32[16,128], index: 5, kind: output, shape index: {}]  }
   0x1   :  { %11 = vsyncpa [#allocation6], 0 }
   0x2   :  { %12 = vsyncpa [#allocation4], 0  ;;  %s3252_s18 = smov [#allocation5]   ;;  %s3158_s22 = scalar_lea.hbm %s3348_s1, 32768 }
   0x3   :  { %s30_s19 = sshll.u32 %s3252_s18, 4  ;;  %p3159_p0 = scmp.ne.s32.totalorder %s3348_s1, %s3158_s22  ;;  %s31_s19 = int_to_ptr.vmem [resolvable:$true] %s30_s19 }
   0x4   :  { %p3162_p1 = scmp.lt.u32.totalorder %s3158_s22, %s3348_s1 }
   0x6   :  { %p3164_p2 = pnand %p3162_p1, %p3159_p0 }
   0x8   :  { %3167 = shalt.err (!%p3164_p2)
}
   0x9   :  { %s3168_s27 = scalar_lea.vmem %s31_s19, 32768  ;;  %p3173_p4 = scmp.lt.s32.totalorder %s31_s19, %s31_s19 }
   0xa   :  { %p3169_p3 = scmp.ne.s32.totalorder %s31_s19, %s3168_s27  ;;  %p3174_p5 = scmp.lt.s32.totalorder %s3168_s27, %s3168_s27 }
   0xc   :  { %p3175_p6 = por %p3174_p5, %p3173_p4 }
   0xe   :  { %p3176_p7 = pnand %p3175_p6, %p3169_p3 }
  0x10   :  { %3179 = shalt.err (!%p3176_p7)
}
  0x11   :  { %s3253_s28 = smov 256   ;;  %s3254_s29 = smov 16  }
  0x12   :  { %36 = dma.hbm_to_vmem [thread:$0]  %s3348_s1, 32768, %s31_s19, [#allocation6], %s3253_s28, %s3253_s28, %s3254_s29  }
  0x13   :  { %s3255_s7 = smov [#allocation2]   ;;  %s3180_s11 = scalar_lea.hbm %s3347_s0, 2048 }
  0x14   :  { %s18_s8 = sshll.u32 %s3255_s7, 4  ;;  %p3181_p8 = scmp.ne.s32.totalorder %s3347_s0, %s3180_s11  ;;  %s19_s8 = int_to_ptr.vmem [resolvable:$true] %s18_s8 }
  0x15   :  { %p3184_p9 = scmp.lt.u32.totalorder %s3180_s11, %s3347_s0 }
  0x17   :  { %p3186_p10 = pnand %p3184_p9, %p3181_p8 }
  0x19   :  { %3189 = shalt.err (!%p3186_p10)
}
  0x1a   :  { %s3190_s16 = scalar_lea.vmem %s19_s8, 2048  ;;  %p3195_p12 = scmp.lt.s32.totalorder %s19_s8, %s19_s8 }
  0x1b   :  { %p3191_p11 = scmp.ne.s32.totalorder %s19_s8, %s3190_s16  ;;  %p3196_p13 = scmp.lt.s32.totalorder %s3190_s16, %s3190_s16 }
  0x1d   :  { %p3197_p0 = por %p3196_p13, %p3195_p12 }
  0x1f   :  { %p3198_p1 = pnand %p3197_p0, %p3191_p11 }
  0x21   :  { %3201 = shalt.err (!%p3198_p1)
}
  0x22   :  { %s3256_s1 = smov 1024   ;;  %s3257_s17 = smov 64  }
  0x23   :  { %24 = dma.hbm_to_vmem [thread:$0]  %s3347_s0, 2048, %s19_s8, [#allocation3], %s3256_s1, %s3256_s1, %s3257_s17  }
  0x24   :  { %s3258_s20 = smov [#allocation7]   ;;  %s3202_s24 = scalar_lea.hbm %s3350_s3, 4096 }
  0x25   :  { %s44_s21 = sshll.u32 %s3258_s20, 4  ;;  %p3203_p2 = scmp.ne.s32.totalorder %s3350_s3, %s3202_s24  ;;  %s45_s21 = int_to_ptr.vmem [resolvable:$true] %s44_s21 }
  0x26   :  { %p3206_p3 = scmp.lt.u32.totalorder %s3202_s24, %s3350_s3 }
  0x28   :  { %p3208_p4 = pnand %p3206_p3, %p3203_p2 }
  0x2a   :  { %3211 = shalt.err (!%p3208_p4)
}
  0x2b   :  { %s3212_s29 = scalar_lea.vmem %s45_s21, 4096  ;;  %p3217_p6 = scmp.lt.s32.totalorder %s45_s21, %s45_s21 }
  0x2c   :  { %p3213_p5 = scmp.ne.s32.totalorder %s45_s21, %s3212_s29  ;;  %p3218_p7 = scmp.lt.s32.totalorder %s3212_s29, %s3212_s29 }
  0x2e   :  { %p3219_p8 = por %p3218_p7, %p3217_p6 }
  0x30   :  { %p3220_p9 = pnand %p3219_p8, %p3213_p5 }
  0x32   :  { %3223 = shalt.err (!%p3220_p9)
}
  0x33   :  { %s3259_s0 = smov 4  }
  0x34   :  { %50 = dma.hbm_to_vmem [thread:$0]  %s3350_s3, 4096, %s45_s21, [#allocation6], %s3257_s17, %s3257_s17, %s3259_s0  }
  0x35   :  { %3246 = dma.done.wait [#allocation3], 2048  }
  0x36   :  { %3247 = vsyncadd [#allocation3], 4294965248 }
  0x37   :  { %3248 = dma.done.wait [#allocation6], 36864  }
  0x38   :  { %3249 = vsyncadd [#allocation6], 4294930432  ;;  %v2742_v0 = vld [vmem:[#allocation5 + $0x4] ss:$16 sps:$4 sm:$0xff]   ;;  %v2744_v1 = vld [vmem:[#allocation5 + $0xc] ss:$16 sps:$4 sm:$0xff]  }
  0x39   :  { %1645 = vmatprep.subr.bf16.mxu0 %v2742_v0  ;;  %v2746_v2 = vld [vmem:[#allocation5] ss:$16 sps:$4 sm:$0xff]   ;;  %v2747_v3 = vld [vmem:[#allocation5 + $0x8] ss:$16 sps:$4 sm:$0xff]   ;;  %1817 = vmatprep.subr.bf16.mxu1 %v2744_v1  ;;  %v2748_v4 = vld [vmem:[#allocation5 + $0x24] ss:$16 sps:$4 sm:$0xff]  }
  0x3a   :  { %1646 = vmatpush1.bf16.msra.mxu0 %v2746_v2  ;;  %1818 = vmatpush1.bf16.msra.mxu1 %v2747_v3  ;;  %v2750_v5 = vld [vmem:[#allocation5 + $0x2c] ss:$16 sps:$4 sm:$0xff]   ;;  %v2752_v6 = vld [vmem:[#allocation5 + $0x20] ss:$16 sps:$4 sm:$0xff]   ;;  %v2753_v7 = vld [vmem:[#allocation5 + $0x28] ss:$16 sps:$4 sm:$0xff]  }
  0x3b   :  { %1647 = vmatprep.subr.bf16.mxu0 %v2748_v4  ;;  %1819 = vmatprep.subr.bf16.mxu1 %v2750_v5  ;;  %v2754_v8 = vld [vmem:[#allocation5 + $0x44] ss:$16 sps:$4 sm:$0xff]   ;;  %v2756_v9 = vld [vmem:[#allocation5 + $0x4c] ss:$16 sps:$4 sm:$0xff]   ;;  %v2758_v10 = vld [vmem:[#allocation5 + $0x40] ss:$16 sps:$4 sm:$0xff]  }
  0x3c   :  { %v2759_v11 = vld [vmem:[#allocation5 + $0x48] ss:$16 sps:$4 sm:$0xff]   ;;  %v2760_v12 = vld [vmem:[#allocation5 + $0x64] ss:$16 sps:$4 sm:$0xff]   ;;  %v2762_v13 = vld [vmem:[#allocation5 + $0x6c] ss:$16 sps:$4 sm:$0xff]  }
  0x3d   :  { %v2764_v14 = vld [vmem:[#allocation5 + $0x60] ss:$16 sps:$4 sm:$0xff]   ;;  %v2765_v15 = vld [vmem:[#allocation5 + $0x68] ss:$16 sps:$4 sm:$0xff]   ;;  %v2766_v16 = vld [vmem:[#allocation5 + $0x84] ss:$16 sps:$4 sm:$0xff]  }
  0x3e   :  { %1648 = vmatpush1.bf16.msra.mxu0 %v2752_v6  ;;  %1820 = vmatpush1.bf16.msra.mxu1 %v2753_v7  ;;  %v2768_v17 = vld [vmem:[#allocation5 + $0x8c] ss:$16 sps:$4 sm:$0xff]   ;;  %v2770_v18 = vld [vmem:[#allocation5 + $0x80] ss:$16 sps:$4 sm:$0xff]   ;;  %v2771_v19 = vld [vmem:[#allocation5 + $0x88] ss:$16 sps:$4 sm:$0xff]  }
  0x3f   :  { %1649 = vmatprep.subr.bf16.mxu0 %v2754_v8  ;;  %1821 = vmatprep.subr.bf16.mxu1 %v2756_v9  ;;  %v2772_v20 = vld [vmem:[#allocation5 + $0xa4] ss:$16 sps:$4 sm:$0xff]   ;;  %v2774_v21 = vld [vmem:[#allocation5 + $0xac] ss:$16 sps:$4 sm:$0xff]   ;;  %v2776_v22 = vld [vmem:[#allocation5 + $0xa0] ss:$16 sps:$4 sm:$0xff]  }
  0x40   :  { %v2777_v23 = vld [vmem:[#allocation5 + $0xa8] ss:$16 sps:$4 sm:$0xff]   ;;  %v2778_v24 = vld [vmem:[#allocation5 + $0xc4] ss:$16 sps:$4 sm:$0xff]   ;;  %v2780_v25 = vld [vmem:[#allocation5 + $0xcc] ss:$16 sps:$4 sm:$0xff]  }
  0x41   :  { %v2782_v26 = vld [vmem:[#allocation5 + $0xc0] ss:$16 sps:$4 sm:$0xff]   ;;  %v2783_v27 = vld [vmem:[#allocation5 + $0xc8] ss:$16 sps:$4 sm:$0xff]   ;;  %v2784_v28 = vld [vmem:[#allocation5 + $0xe4] ss:$16 sps:$4 sm:$0xff]  }
  0x42   :  { %1650 = vmatpush1.bf16.msra.mxu0 %v2758_v10  ;;  %1822 = vmatpush1.bf16.msra.mxu1 %v2759_v11  ;;  %v2786_v29 = vld [vmem:[#allocation5 + $0xec] ss:$16 sps:$4 sm:$0xff]   ;;  %v2788_v30 = vld [vmem:[#allocation5 + $0xe0] ss:$16 sps:$4 sm:$0xff]   ;;  %v2789_v31 = vld [vmem:[#allocation5 + $0xe8] ss:$16 sps:$4 sm:$0xff]  }
  0x43   :  { %1651 = vmatprep.subr.bf16.mxu0 %v2760_v12  ;;  %1823 = vmatprep.subr.bf16.mxu1 %v2762_v13  ;;  %v2790_v32 = vld [vmem:[#allocation5 + $0x104] ss:$16 sps:$4 sm:$0xff]   ;;  %v2792_v33 = vld [vmem:[#allocation5 + $0x10c] ss:$16 sps:$4 sm:$0xff]   ;;  %v2794_v34 = vld [vmem:[#allocation5 + $0x100] ss:$16 sps:$4 sm:$0xff]  }
  0x44   :  { %v2795_v35 = vld [vmem:[#allocation5 + $0x108] ss:$16 sps:$4 sm:$0xff]   ;;  %v2796_v36 = vld [vmem:[#allocation5 + $0x124] ss:$16 sps:$4 sm:$0xff]   ;;  %v2798_v37 = vld [vmem:[#allocation5 + $0x12c] ss:$16 sps:$4 sm:$0xff]  }
  0x45   :  { %v2800_v38 = vld [vmem:[#allocation5 + $0x120] ss:$16 sps:$4 sm:$0xff]   ;;  %v2801_v39 = vld [vmem:[#allocation5 + $0x128] ss:$16 sps:$4 sm:$0xff]   ;;  %v2802_v40 = vld [vmem:[#allocation5 + $0x144] ss:$16 sps:$4 sm:$0xff]  }
  0x46   :  { %1652 = vmatpush1.bf16.msra.mxu0 %v2764_v14  ;;  %1824 = vmatpush1.bf16.msra.mxu1 %v2765_v15  ;;  %v2804_v41 = vld [vmem:[#allocation5 + $0x14c] ss:$16 sps:$4 sm:$0xff]   ;;  %v2806_v42 = vld [vmem:[#allocation5 + $0x140] ss:$16 sps:$4 sm:$0xff]   ;;  %v2807_v43 = vld [vmem:[#allocation5 + $0x148] ss:$16 sps:$4 sm:$0xff]  }
  0x47   :  { %1653 = vmatprep.subr.bf16.mxu0 %v2766_v16  ;;  %1825 = vmatprep.subr.bf16.mxu1 %v2768_v17  ;;  %v2808_v44 = vld [vmem:[#allocation5 + $0x164] ss:$16 sps:$4 sm:$0xff]   ;;  %v2810_v45 = vld [vmem:[#allocation5 + $0x16c] ss:$16 sps:$4 sm:$0xff]   ;;  %v2812_v48 = vld [vmem:[#allocation5 + $0x160] ss:$16 sps:$4 sm:$0xff]  }
  0x48   :  { %v64_v46 = vld [vmem:[#allocation2 + $0x8] sm:$0xff]  ;;  %v2814_v51 = vld [vmem:[#allocation5 + $0x184] ss:$16 sps:$4 sm:$0xff]   ;;  %v2818_v53 = vld [vmem:[#allocation5 + $0x180] ss:$16 sps:$4 sm:$0xff]   ;;  %s3260_s9 = smov [#allocation8]  }
  0x49   :  { %v72_v47 = vld [vmem:[#allocation2 + $0x48] sm:$0xff]  ;;  %v2820_v55 = vld [vmem:[#allocation5 + $0x1a4] ss:$16 sps:$4 sm:$0xff]   ;;  %v2824_v57 = vld [vmem:[#allocation5 + $0x1a0] ss:$16 sps:$4 sm:$0xff]   ;;  %s2353_s10 = sshll.u32 %s3260_s9, 4  ;;  %s2354_s10 = int_to_ptr.vmem [resolvable:$true] %s2353_s10 }
  0x4a   :  { %1654 = vmatpush1.bf16.msra.mxu0 %v2770_v18  ;;  %1826 = vmatpush1.bf16.msra.mxu1 %v2771_v19  ;;  %v2813_v49 = vld [vmem:[#allocation5 + $0x168] ss:$16 sps:$4 sm:$0xff]   ;;  %v80_v50 = vpack.c.bf16 %v72_v47, %v64_v46  ;;  %v2816_v52 = vld [vmem:[#allocation5 + $0x18c] ss:$16 sps:$4 sm:$0xff]   ;;  %v2826_v59 = vld [vmem:[#allocation5 + $0x1c4] ss:$16 sps:$4 sm:$0xff]   ;;  %p3229_p11 = scmp.lt.s32.totalorder %s2354_s10, %s2354_s10 }
  0x4b   :  { %1655 = vmatprep.subr.bf16.mxu0 %v2772_v20  ;;  %1827 = vmatprep.subr.bf16.mxu1 %v2774_v21  ;;  %v2819_v54 = vld [vmem:[#allocation5 + $0x188] ss:$16 sps:$4 sm:$0xff]   ;;  %v2822_v56 = vld [vmem:[#allocation5 + $0x1ac] ss:$16 sps:$4 sm:$0xff]   ;;  %v2830_v61 = vld [vmem:[#allocation5 + $0x1c0] ss:$16 sps:$4 sm:$0xff]  }
  0x4c   :  { %1677 = vmatprep.mubr.bf16.mxu0 %v80_v50  ;;  %1849 = vmatprep.mubr.bf16.mxu1 %v80_v50  ;;  %v2825_v58 = vld [vmem:[#allocation5 + $0x1a8] ss:$16 sps:$4 sm:$0xff]   ;;  %v2828_v60 = vld [vmem:[#allocation5 + $0x1cc] ss:$16 sps:$4 sm:$0xff]   ;;  %v2832_v63 = vld [vmem:[#allocation5 + $0x1e4] ss:$16 sps:$4 sm:$0xff]  }
  0x4d   :  { %v2831_v62 = vld [vmem:[#allocation5 + $0x1c8] ss:$16 sps:$4 sm:$0xff]   ;;  %v2834_v0 = vld [vmem:[#allocation5 + $0x1ec] ss:$16 sps:$4 sm:$0xff]   ;;  %v2836_v1 = vld [vmem:[#allocation5 + $0x1e0] ss:$16 sps:$4 sm:$0xff]  }
  0x4e   :  { %1656 = vmatpush1.bf16.msra.mxu0 %v2776_v22  ;;  %1828 = vmatpush1.bf16.msra.mxu1 %v2777_v23  ;;  %v2837_v2 = vld [vmem:[#allocation5 + $0x1e8] ss:$16 sps:$4 sm:$0xff]   ;;  %v2840_v3 = vld [vmem:[#allocation5 + $0x204] ss:$16 sps:$4 sm:$0xff]   ;;  %v2843_v6 = vld [vmem:[#allocation5 + $0x20c] ss:$16 sps:$4 sm:$0xff]  }
  0x4f   :  { %1657 = vmatprep.subr.bf16.mxu0 %v2778_v24  ;;  %1829 = vmatprep.subr.bf16.mxu1 %v2780_v25  ;;  %v63_v4 = vld [vmem:[#allocation2] sm:$0xff]  ;;  %v2841_v8 = vld [vmem:[#allocation5 + $0x208] ss:$16 sps:$4 sm:$0xff]   ;;  %v2849_v11 = vld [vmem:[#allocation5 + $0x22c] ss:$16 sps:$4 sm:$0xff]  }
  0x50   :  { %v71_v5 = vld [vmem:[#allocation2 + $0x40] sm:$0xff]  ;;  %v2847_v13 = vld [vmem:[#allocation5 + $0x228] ss:$16 sps:$4 sm:$0xff]   ;;  %v2855_v15 = vld [vmem:[#allocation5 + $0x24c] ss:$16 sps:$4 sm:$0xff]  }
  0x51   :  { %v2838_v7 = vld [vmem:[#allocation5 + $0x200] ss:$16 sps:$4 sm:$0xff]   ;;  %v79_v9 = vpack.c.bf16 %v71_v5, %v63_v4  ;;  %v2846_v10 = vld [vmem:[#allocation5 + $0x224] ss:$16 sps:$4 sm:$0xff]   ;;  %v2853_v17 = vld [vmem:[#allocation5 + $0x248] ss:$16 sps:$4 sm:$0xff]  }
  0x52   :  { %1658 = vmatpush1.bf16.msra.mxu0 %v2782_v26  ;;  %1830 = vmatpush1.bf16.msra.mxu1 %v2783_v27  ;;  %v2844_v12 = vld [vmem:[#allocation5 + $0x220] ss:$16 sps:$4 sm:$0xff]   ;;  %v2852_v14 = vld [vmem:[#allocation5 + $0x244] ss:$16 sps:$4 sm:$0xff]   ;;  %v2861_v19 = vld [vmem:[#allocation5 + $0x26c] ss:$16 sps:$4 sm:$0xff]  }
  0x53   :  { %1659 = vmatprep.subr.bf16.mxu0 %v2784_v28  ;;  %1831 = vmatprep.subr.bf16.mxu1 %v2786_v29  ;;  %v2850_v16 = vld [vmem:[#allocation5 + $0x240] ss:$16 sps:$4 sm:$0xff]   ;;  %v2858_v18 = vld [vmem:[#allocation5 + $0x264] ss:$16 sps:$4 sm:$0xff]   ;;  %v2859_v21 = vld [vmem:[#allocation5 + $0x268] ss:$16 sps:$4 sm:$0xff]  }
  0x54   :  { %v2856_v20 = vld [vmem:[#allocation5 + $0x260] ss:$16 sps:$4 sm:$0xff]   ;;  %v2864_v22 = vld [vmem:[#allocation5 + $0x284] ss:$16 sps:$4 sm:$0xff]   ;;  %v2867_v23 = vld [vmem:[#allocation5 + $0x28c] ss:$16 sps:$4 sm:$0xff]  }
  0x55   :  { %v2862_v24 = vld [vmem:[#allocation5 + $0x280] ss:$16 sps:$4 sm:$0xff]   ;;  %v2865_v25 = vld [vmem:[#allocation5 + $0x288] ss:$16 sps:$4 sm:$0xff]   ;;  %v2870_v26 = vld [vmem:[#allocation5 + $0x2a4] ss:$16 sps:$4 sm:$0xff]  }
  0x56   :  { %1660 = vmatpush1.bf16.msra.mxu0 %v2788_v30  ;;  %1832 = vmatpush1.bf16.msra.mxu1 %v2789_v31  ;;  %v2873_v27 = vld [vmem:[#allocation5 + $0x2ac] ss:$16 sps:$4 sm:$0xff]   ;;  %v2868_v28 = vld [vmem:[#allocation5 + $0x2a0] ss:$16 sps:$4 sm:$0xff]   ;;  %v2871_v29 = vld [vmem:[#allocation5 + $0x2a8] ss:$16 sps:$4 sm:$0xff]  }
  0x57   :  { %1661 = vmatprep.subr.bf16.mxu0 %v2790_v32  ;;  %1833 = vmatprep.subr.bf16.mxu1 %v2792_v33  ;;  %v2876_v30 = vld [vmem:[#allocation5 + $0x2c4] ss:$16 sps:$4 sm:$0xff]   ;;  %v2879_v31 = vld [vmem:[#allocation5 + $0x2cc] ss:$16 sps:$4 sm:$0xff]   ;;  %v2892_v47 = vld [vmem:[#allocation5 + $0x320] ss:$16 sps:$4 sm:$0xff]  }
  0x58   :  { %v66_v32 = vld [vmem:[#allocation2 + $0x18] sm:$0xff]  ;;  %v2930_v5 = vld [vmem:[#allocation5 + $0x3e4] ss:$16 sps:$4 sm:$0xff]  }
  0x59   :  { %v74_v33 = vld [vmem:[#allocation2 + $0x58] sm:$0xff] }
  0x5a   :  { %1662 = vmatpush1.bf16.msra.mxu0 %v2794_v34  ;;  %1834 = vmatpush1.bf16.msra.mxu1 %v2795_v35  ;;  %v2874_v34 = vld [vmem:[#allocation5 + $0x2c0] ss:$16 sps:$4 sm:$0xff]   ;;  %v2877_v35 = vld [vmem:[#allocation5 + $0x2c8] ss:$16 sps:$4 sm:$0xff]   ;;  %v2897_v46 = vld [vmem:[#allocation5 + $0x32c] ss:$16 sps:$4 sm:$0xff]  }
  0x5b   :  { %1663 = vmatprep.subr.bf16.mxu0 %v2796_v36  ;;  %1835 = vmatprep.subr.bf16.mxu1 %v2798_v37  ;;  %v82_v36 = vpack.c.bf16 %v74_v33, %v66_v32  ;;  %v2882_v37 = vld [vmem:[#allocation5 + $0x2e4] ss:$16 sps:$4 sm:$0xff]   ;;  %v2903_v50 = vld [vmem:[#allocation5 + $0x34c] ss:$16 sps:$4 sm:$0xff]   ;;  %v2925_v4 = vld [vmem:[#allocation5 + $0x3c8] ss:$16 sps:$4 sm:$0xff]  }
  0x5c   :  { %v2963_v32 = vld [vmem:[#allocation5 + $0x48c] ss:$16 sps:$4 sm:$0xff]   ;;  %v2958_v33 = vld [vmem:[#allocation5 + $0x480] ss:$16 sps:$4 sm:$0xff]  }
  0x5e   :  { %1664 = vmatpush1.bf16.msra.mxu0 %v2800_v38  ;;  %1836 = vmatpush1.bf16.msra.mxu1 %v2801_v39  ;;  %v2885_v38 = vld [vmem:[#allocation5 + $0x2ec] ss:$16 sps:$4 sm:$0xff]   ;;  %v2880_v39 = vld [vmem:[#allocation5 + $0x2e0] ss:$16 sps:$4 sm:$0xff]  }
  0x5f   :  { %1665 = vmatprep.subr.bf16.mxu0 %v2802_v40  ;;  %1837 = vmatprep.subr.bf16.mxu1 %v2804_v41  ;;  %v2883_v40 = vld [vmem:[#allocation5 + $0x2e8] ss:$16 sps:$4 sm:$0xff]   ;;  %v2888_v41 = vld [vmem:[#allocation5 + $0x304] ss:$16 sps:$4 sm:$0xff]  }
  0x62   :  { %1666 = vmatpush1.bf16.msra.mxu0 %v2806_v42  ;;  %1838 = vmatpush1.bf16.msra.mxu1 %v2807_v43  ;;  %v2891_v42 = vld [vmem:[#allocation5 + $0x30c] ss:$16 sps:$4 sm:$0xff]   ;;  %v2886_v43 = vld [vmem:[#allocation5 + $0x300] ss:$16 sps:$4 sm:$0xff]  }
  0x63   :  { %1667 = vmatprep.subr.bf16.mxu0 %v2808_v44  ;;  %1839 = vmatprep.subr.bf16.mxu1 %v2810_v45  ;;  %v2889_v44 = vld [vmem:[#allocation5 + $0x308] ss:$16 sps:$4 sm:$0xff]   ;;  %v2894_v45 = vld [vmem:[#allocation5 + $0x324] ss:$16 sps:$4 sm:$0xff]  }
  0x66   :  { %1668 = vmatpush1.bf16.msra.mxu0 %v2812_v48  ;;  %1840 = vmatpush1.bf16.msra.mxu1 %v2813_v49  ;;  %v2895_v48 = vld [vmem:[#allocation5 + $0x328] ss:$16 sps:$4 sm:$0xff]   ;;  %v2900_v49 = vld [vmem:[#allocation5 + $0x344] ss:$16 sps:$4 sm:$0xff]  }
  0x67   :  { %1669 = vmatprep.subr.bf16.mxu0 %v2814_v51  ;;  %1841 = vmatprep.subr.bf16.mxu1 %v2816_v52  ;;  %v2898_v51 = vld [vmem:[#allocation5 + $0x340] ss:$16 sps:$4 sm:$0xff]   ;;  %v2901_v52 = vld [vmem:[#allocation5 + $0x348] ss:$16 sps:$4 sm:$0xff]  }
  0x6a   :  { %1670 = vmatpush1.bf16.msra.mxu0 %v2818_v53  ;;  %1842 = vmatpush1.bf16.msra.mxu1 %v2819_v54  ;;  %v2906_v53 = vld [vmem:[#allocation5 + $0x364] ss:$16 sps:$4 sm:$0xff]   ;;  %v2909_v54 = vld [vmem:[#allocation5 + $0x36c] ss:$16 sps:$4 sm:$0xff]  }
  0x6b   :  { %1671 = vmatprep.subr.bf16.mxu0 %v2820_v55  ;;  %1843 = vmatprep.subr.bf16.mxu1 %v2822_v56  ;;  %v2904_v55 = vld [vmem:[#allocation5 + $0x360] ss:$16 sps:$4 sm:$0xff]   ;;  %v2907_v56 = vld [vmem:[#allocation5 + $0x368] ss:$16 sps:$4 sm:$0xff]  }
  0x6e   :  { %1672 = vmatpush1.bf16.msra.mxu0 %v2824_v57  ;;  %1844 = vmatpush1.bf16.msra.mxu1 %v2825_v58  ;;  %v2912_v57 = vld [vmem:[#allocation5 + $0x384] ss:$16 sps:$4 sm:$0xff]   ;;  %v2915_v58 = vld [vmem:[#allocation5 + $0x38c] ss:$16 sps:$4 sm:$0xff]  }
  0x6f   :  { %1673 = vmatprep.subr.bf16.mxu0 %v2826_v59  ;;  %1845 = vmatprep.subr.bf16.mxu1 %v2828_v60  ;;  %v2910_v59 = vld [vmem:[#allocation5 + $0x380] ss:$16 sps:$4 sm:$0xff]   ;;  %v2913_v60 = vld [vmem:[#allocation5 + $0x388] ss:$16 sps:$4 sm:$0xff]  }
  0x72   :  { %1674 = vmatpush1.bf16.msra.mxu0 %v2830_v61  ;;  %1846 = vmatpush1.bf16.msra.mxu1 %v2831_v62  ;;  %v2918_v61 = vld [vmem:[#allocation5 + $0x3a4] ss:$16 sps:$4 sm:$0xff]   ;;  %v2921_v62 = vld [vmem:[#allocation5 + $0x3ac] ss:$16 sps:$4 sm:$0xff]  }
  0x73   :  { %1675 = vmatprep.subr.bf16.mxu0 %v2832_v63  ;;  %1847 = vmatprep.subr.bf16.mxu1 %v2834_v0  ;;  %v2916_v63 = vld [vmem:[#allocation5 + $0x3a0] ss:$16 sps:$4 sm:$0xff]   ;;  %v2919_v0 = vld [vmem:[#allocation5 + $0x3a8] ss:$16 sps:$4 sm:$0xff]  }
  0x76   :  { %1676 = vmatpush1.bf16.msra.mxu0 %v2836_v1  ;;  %1848 = vmatpush1.bf16.msra.mxu1 %v2837_v2  ;;  %v2924_v1 = vld [vmem:[#allocation5 + $0x3c4] ss:$16 sps:$4 sm:$0xff]   ;;  %v2927_v2 = vld [vmem:[#allocation5 + $0x3cc] ss:$16 sps:$4 sm:$0xff]  }
  0x77   :  { %1688 = vmatprep.subr.bf16.mxu0 %v2840_v3  ;;  %1860 = vmatprep.subr.bf16.mxu1 %v2843_v6  ;;  %v2922_v3 = vld [vmem:[#allocation5 + $0x3c0] ss:$16 sps:$4 sm:$0xff]   ;;  %v2933_v6 = vld [vmem:[#allocation5 + $0x3ec] ss:$16 sps:$4 sm:$0xff]  }
  0x79   :  { %1678 = vmatmul.mubr.bf16.vlgmr.msra.gmra.mrb[0].mxu0 %v79_v9  ;;  %1850 = vmatmul.mubr.bf16.vlgmr.msra.gmra.mrb[0].mxu1 %v79_v9  ;;  %v2936_v9 = vld [vmem:[#allocation5 + $0x404] ss:$16 sps:$4 sm:$0xff]  }
  0x7a   :  { %1689 = vmatpush1.bf16.msra.mxu0 %v2838_v7  ;;  %1861 = vmatpush1.bf16.msra.mxu1 %v2841_v8  ;;  %v2928_v7 = vld [vmem:[#allocation5 + $0x3e0] ss:$16 sps:$4 sm:$0xff]   ;;  %v2931_v8 = vld [vmem:[#allocation5 + $0x3e8] ss:$16 sps:$4 sm:$0xff]  }
  0x7b   :  { %1690 = vmatprep.subr.bf16.mxu0 %v2846_v10  ;;  %1862 = vmatprep.subr.bf16.mxu1 %v2849_v11  ;;  %v65_v10 = vld [vmem:[#allocation2 + $0x10] sm:$0xff] }
  0x7c   :  { %1720 = vmatprep.mubr.bf16.mxu0 %v82_v36  ;;  %1892 = vmatprep.mubr.bf16.mxu1 %v82_v36  ;;  %v73_v11 = vld [vmem:[#allocation2 + $0x50] sm:$0xff]  ;;  %v2969_v36 = vld [vmem:[#allocation5 + $0x4ac] ss:$16 sps:$4 sm:$0xff]  }
  0x7e   :  { %1691 = vmatpush1.bf16.msra.mxu0 %v2844_v12  ;;  %1863 = vmatpush1.bf16.msra.mxu1 %v2847_v13  ;;  %v2939_v12 = vld [vmem:[#allocation5 + $0x40c] ss:$16 sps:$4 sm:$0xff]   ;;  %v2934_v13 = vld [vmem:[#allocation5 + $0x400] ss:$16 sps:$4 sm:$0xff]  }
  0x7f   :  { %1692 = vmatprep.subr.bf16.mxu0 %v2852_v14  ;;  %1864 = vmatprep.subr.bf16.mxu1 %v2855_v15  ;;  %v2937_v14 = vld [vmem:[#allocation5 + $0x408] ss:$16 sps:$4 sm:$0xff]   ;;  %v81_v15 = vpack.c.bf16 %v73_v11, %v65_v10  ;;  %v3026_v11 = vld [vmem:[#allocation5 + $0x5e4] ss:$16 sps:$4 sm:$0xff]  }
  0x80   :  { %v3021_v10 = vld [vmem:[#allocation5 + $0x5c8] ss:$16 sps:$4 sm:$0xff]  }
  0x82   :  { %1693 = vmatpush1.bf16.msra.mxu0 %v2850_v16  ;;  %1865 = vmatpush1.bf16.msra.mxu1 %v2853_v17  ;;  %v2942_v16 = vld [vmem:[#allocation5 + $0x424] ss:$16 sps:$4 sm:$0xff]   ;;  %v2945_v17 = vld [vmem:[#allocation5 + $0x42c] ss:$16 sps:$4 sm:$0xff]  }
  0x83   :  { %1694 = vmatprep.subr.bf16.mxu0 %v2858_v18  ;;  %1866 = vmatprep.subr.bf16.mxu1 %v2861_v19  ;;  %v68_v18 = vld [vmem:[#allocation2 + $0x28] sm:$0xff] }
  0x84   :  { %v76_v19 = vld [vmem:[#allocation2 + $0x68] sm:$0xff] }
  0x86   :  { %1695 = vmatpush1.bf16.msra.mxu0 %v2856_v20  ;;  %1867 = vmatpush1.bf16.msra.mxu1 %v2859_v21  ;;  %v2940_v20 = vld [vmem:[#allocation5 + $0x420] ss:$16 sps:$4 sm:$0xff]   ;;  %v2943_v21 = vld [vmem:[#allocation5 + $0x428] ss:$16 sps:$4 sm:$0xff]  }
  0x87   :  { %1696 = vmatprep.subr.bf16.mxu0 %v2864_v22  ;;  %1868 = vmatprep.subr.bf16.mxu1 %v2867_v23  ;;  %v84_v22 = vpack.c.bf16 %v76_v19, %v68_v18  ;;  %v2948_v23 = vld [vmem:[#allocation5 + $0x444] ss:$16 sps:$4 sm:$0xff]   ;;  %v3035_v18 = vld [vmem:[#allocation5 + $0x60c] ss:$16 sps:$4 sm:$0xff]   ;;  %v3030_v19 = vld [vmem:[#allocation5 + $0x600] ss:$16 sps:$4 sm:$0xff]  }
  0x8a   :  { %1697 = vmatpush1.bf16.msra.mxu0 %v2862_v24  ;;  %1869 = vmatpush1.bf16.msra.mxu1 %v2865_v25  ;;  %v2951_v24 = vld [vmem:[#allocation5 + $0x44c] ss:$16 sps:$4 sm:$0xff]   ;;  %v2946_v25 = vld [vmem:[#allocation5 + $0x440] ss:$16 sps:$4 sm:$0xff]  }
  0x8b   :  { %1698 = vmatprep.subr.bf16.mxu0 %v2870_v26  ;;  %1870 = vmatprep.subr.bf16.mxu1 %v2873_v27  ;;  %v2949_v26 = vld [vmem:[#allocation5 + $0x448] ss:$16 sps:$4 sm:$0xff]   ;;  %v2954_v27 = vld [vmem:[#allocation5 + $0x464] ss:$16 sps:$4 sm:$0xff]  }
  0x8e   :  { %1699 = vmatpush1.bf16.msra.mxu0 %v2868_v28  ;;  %1871 = vmatpush1.bf16.msra.mxu1 %v2871_v29  ;;  %v2957_v28 = vld [vmem:[#allocation5 + $0x46c] ss:$16 sps:$4 sm:$0xff]   ;;  %v2952_v29 = vld [vmem:[#allocation5 + $0x460] ss:$16 sps:$4 sm:$0xff]  }
  0x8f   :  { %1700 = vmatprep.subr.bf16.mxu0 %v2876_v30  ;;  %1872 = vmatprep.subr.bf16.mxu1 %v2879_v31  ;;  %v2955_v30 = vld [vmem:[#allocation5 + $0x468] ss:$16 sps:$4 sm:$0xff]   ;;  %v2960_v31 = vld [vmem:[#allocation5 + $0x484] ss:$16 sps:$4 sm:$0xff]  }
  0x92   :  { %1701 = vmatpush1.bf16.msra.mxu0 %v2874_v34  ;;  %1873 = vmatpush1.bf16.msra.mxu1 %v2877_v35  ;;  %v2961_v34 = vld [vmem:[#allocation5 + $0x488] ss:$16 sps:$4 sm:$0xff]   ;;  %v2966_v35 = vld [vmem:[#allocation5 + $0x4a4] ss:$16 sps:$4 sm:$0xff]  }
  0x93   :  { %1702 = vmatprep.subr.bf16.mxu0 %v2882_v37  ;;  %1874 = vmatprep.subr.bf16.mxu1 %v2885_v38  ;;  %v2964_v37 = vld [vmem:[#allocation5 + $0x4a0] ss:$16 sps:$4 sm:$0xff]   ;;  %v2967_v38 = vld [vmem:[#allocation5 + $0x4a8] ss:$16 sps:$4 sm:$0xff]  }
  0x96   :  { %1703 = vmatpush1.bf16.msra.mxu0 %v2880_v39  ;;  %1875 = vmatpush1.bf16.msra.mxu1 %v2883_v40  ;;  %v2972_v39 = vld [vmem:[#allocation5 + $0x4c4] ss:$16 sps:$4 sm:$0xff]   ;;  %v2975_v40 = vld [vmem:[#allocation5 + $0x4cc] ss:$16 sps:$4 sm:$0xff]  }
  0x97   :  { %1704 = vmatprep.subr.bf16.mxu0 %v2888_v41  ;;  %1876 = vmatprep.subr.bf16.mxu1 %v2891_v42  ;;  %v2970_v41 = vld [vmem:[#allocation5 + $0x4c0] ss:$16 sps:$4 sm:$0xff]   ;;  %v2973_v42 = vld [vmem:[#allocation5 + $0x4c8] ss:$16 sps:$4 sm:$0xff]  }
  0x9a   :  { %1705 = vmatpush1.bf16.msra.mxu0 %v2886_v43  ;;  %1877 = vmatpush1.bf16.msra.mxu1 %v2889_v44  ;;  %v2978_v43 = vld [vmem:[#allocation5 + $0x4e4] ss:$16 sps:$4 sm:$0xff]   ;;  %v2981_v44 = vld [vmem:[#allocation5 + $0x4ec] ss:$16 sps:$4 sm:$0xff]  }
  0x9b   :  { %1706 = vmatprep.subr.bf16.mxu0 %v2894_v45  ;;  %1878 = vmatprep.subr.bf16.mxu1 %v2897_v46  ;;  %v2976_v45 = vld [vmem:[#allocation5 + $0x4e0] ss:$16 sps:$4 sm:$0xff]   ;;  %v2979_v46 = vld [vmem:[#allocation5 + $0x4e8] ss:$16 sps:$4 sm:$0xff]  }
  0x9e   :  { %1707 = vmatpush1.bf16.msra.mxu0 %v2892_v47  ;;  %1879 = vmatpush1.bf16.msra.mxu1 %v2895_v48  ;;  %v2984_v47 = vld [vmem:[#allocation5 + $0x504] ss:$16 sps:$4 sm:$0xff]   ;;  %v2987_v48 = vld [vmem:[#allocation5 + $0x50c] ss:$16 sps:$4 sm:$0xff]  }
  0x9f   :  { %1708 = vmatprep.subr.bf16.mxu0 %v2900_v49  ;;  %1880 = vmatprep.subr.bf16.mxu1 %v2903_v50  ;;  %v2982_v49 = vld [vmem:[#allocation5 + $0x500] ss:$16 sps:$4 sm:$0xff]   ;;  %v2985_v50 = vld [vmem:[#allocation5 + $0x508] ss:$16 sps:$4 sm:$0xff]  }
  0xa2   :  { %1709 = vmatpush1.bf16.msra.mxu0 %v2898_v51  ;;  %1881 = vmatpush1.bf16.msra.mxu1 %v2901_v52  ;;  %v2990_v51 = vld [vmem:[#allocation5 + $0x524] ss:$16 sps:$4 sm:$0xff]   ;;  %v2993_v52 = vld [vmem:[#allocation5 + $0x52c] ss:$16 sps:$4 sm:$0xff]  }
  0xa3   :  { %1710 = vmatprep.subr.bf16.mxu0 %v2906_v53  ;;  %1882 = vmatprep.subr.bf16.mxu1 %v2909_v54  ;;  %v2988_v53 = vld [vmem:[#allocation5 + $0x520] ss:$16 sps:$4 sm:$0xff]   ;;  %v2991_v54 = vld [vmem:[#allocation5 + $0x528] ss:$16 sps:$4 sm:$0xff]  }
  0xa6   :  { %1711 = vmatpush1.bf16.msra.mxu0 %v2904_v55  ;;  %1883 = vmatpush1.bf16.msra.mxu1 %v2907_v56  ;;  %v2996_v55 = vld [vmem:[#allocation5 + $0x544] ss:$16 sps:$4 sm:$0xff]   ;;  %v2999_v56 = vld [vmem:[#allocation5 + $0x54c] ss:$16 sps:$4 sm:$0xff]  }
  0xa7   :  { %1712 = vmatprep.subr.bf16.mxu0 %v2912_v57  ;;  %1884 = vmatprep.subr.bf16.mxu1 %v2915_v58  ;;  %v2994_v57 = vld [vmem:[#allocation5 + $0x540] ss:$16 sps:$4 sm:$0xff]   ;;  %v2997_v58 = vld [vmem:[#allocation5 + $0x548] ss:$16 sps:$4 sm:$0xff]  }
  0xaa   :  { %1713 = vmatpush1.bf16.msra.mxu0 %v2910_v59  ;;  %1885 = vmatpush1.bf16.msra.mxu1 %v2913_v60  ;;  %v3002_v59 = vld [vmem:[#allocation5 + $0x564] ss:$16 sps:$4 sm:$0xff]   ;;  %v3005_v60 = vld [vmem:[#allocation5 + $0x56c] ss:$16 sps:$4 sm:$0xff]  }
  0xab   :  { %1714 = vmatprep.subr.bf16.mxu0 %v2918_v61  ;;  %1886 = vmatprep.subr.bf16.mxu1 %v2921_v62  ;;  %v3000_v61 = vld [vmem:[#allocation5 + $0x560] ss:$16 sps:$4 sm:$0xff]   ;;  %v3003_v62 = vld [vmem:[#allocation5 + $0x568] ss:$16 sps:$4 sm:$0xff]  }
  0xae   :  { %1715 = vmatpush1.bf16.msra.mxu0 %v2916_v63  ;;  %1887 = vmatpush1.bf16.msra.mxu1 %v2919_v0  ;;  %v3008_v63 = vld [vmem:[#allocation5 + $0x584] ss:$16 sps:$4 sm:$0xff]   ;;  %v3011_v0 = vld [vmem:[#allocation5 + $0x58c] ss:$16 sps:$4 sm:$0xff]  }
  0xaf   :  { %1716 = vmatprep.subr.bf16.mxu0 %v2924_v1  ;;  %1888 = vmatprep.subr.bf16.mxu1 %v2927_v2  ;;  %v3006_v1 = vld [vmem:[#allocation5 + $0x580] ss:$16 sps:$4 sm:$0xff]   ;;  %v3009_v2 = vld [vmem:[#allocation5 + $0x588] ss:$16 sps:$4 sm:$0xff]  }
  0xb2   :  { %1717 = vmatpush1.bf16.msra.mxu0 %v2922_v3  ;;  %1889 = vmatpush1.bf16.msra.mxu1 %v2925_v4  ;;  %v3014_v3 = vld [vmem:[#allocation5 + $0x5a4] ss:$16 sps:$4 sm:$0xff]   ;;  %v3017_v4 = vld [vmem:[#allocation5 + $0x5ac] ss:$16 sps:$4 sm:$0xff]  }
  0xb3   :  { %1718 = vmatprep.subr.bf16.mxu0 %v2930_v5  ;;  %1890 = vmatprep.subr.bf16.mxu1 %v2933_v6  ;;  %v3012_v5 = vld [vmem:[#allocation5 + $0x5a0] ss:$16 sps:$4 sm:$0xff]   ;;  %v3015_v6 = vld [vmem:[#allocation5 + $0x5a8] ss:$16 sps:$4 sm:$0xff]  }
  0xb6   :  { %1719 = vmatpush1.bf16.msra.mxu0 %v2928_v7  ;;  %1891 = vmatpush1.bf16.msra.mxu1 %v2931_v8  ;;  %v3020_v7 = vld [vmem:[#allocation5 + $0x5c4] ss:$16 sps:$4 sm:$0xff]   ;;  %v3023_v8 = vld [vmem:[#allocation5 + $0x5cc] ss:$16 sps:$4 sm:$0xff]  }
  0xb7   :  { %1731 = vmatprep.subr.bf16.mxu0 %v2936_v9  ;;  %1903 = vmatprep.subr.bf16.mxu1 %v2939_v12  ;;  %v3018_v9 = vld [vmem:[#allocation5 + $0x5c0] ss:$16 sps:$4 sm:$0xff]   ;;  %v3029_v12 = vld [vmem:[#allocation5 + $0x5ec] ss:$16 sps:$4 sm:$0xff]  }
  0xb9   :  { %1721 = vmatmul.mubr.bf16.vlgmr.msra.gmra.mrb[0].mxu0 %v81_v15  ;;  %1893 = vmatmul.mubr.bf16.vlgmr.msra.gmra.mrb[0].mxu1 %v81_v15  ;;  %v3032_v15 = vld [vmem:[#allocation5 + $0x604] ss:$16 sps:$4 sm:$0xff]  }
  0xba   :  { %1732 = vmatpush1.bf16.msra.mxu0 %v2934_v13  ;;  %1904 = vmatpush1.bf16.msra.mxu1 %v2937_v14  ;;  %v3024_v13 = vld [vmem:[#allocation5 + $0x5e0] ss:$16 sps:$4 sm:$0xff]   ;;  %v3027_v14 = vld [vmem:[#allocation5 + $0x5e8] ss:$16 sps:$4 sm:$0xff]  }
  0xbb   :  { %1733 = vmatprep.subr.bf16.mxu0 %v2942_v16  ;;  %1905 = vmatprep.subr.bf16.mxu1 %v2945_v17  ;;  %v67_v16 = vld [vmem:[#allocation2 + $0x20] sm:$0xff] }
  0xbc   :  { %1763 = vmatprep.mubr.bf16.mxu0 %v84_v22  ;;  %1935 = vmatprep.mubr.bf16.mxu1 %v84_v22  ;;  %v75_v17 = vld [vmem:[#allocation2 + $0x60] sm:$0xff] }
  0xbd   :  { %v83_v22 = vpack.c.bf16 %v75_v17, %v67_v16  ;;  %v3117_v16 = vld [vmem:[#allocation5 + $0x7c8] ss:$16 sps:$4 sm:$0xff]   ;;  %v3122_v17 = vld [vmem:[#allocation5 + $0x7e4] ss:$16 sps:$4 sm:$0xff]  }
  0xbe   :  { %1734 = vmatpush1.bf16.msra.mxu0 %v2940_v20  ;;  %1906 = vmatpush1.bf16.msra.mxu1 %v2943_v21  ;;  %v3033_v20 = vld [vmem:[#allocation5 + $0x608] ss:$16 sps:$4 sm:$0xff]  }
  0xbf   :  { %1735 = vmatprep.subr.bf16.mxu0 %v2948_v23  ;;  %1907 = vmatprep.subr.bf16.mxu1 %v2951_v24  ;;  %v70_v21 = vld [vmem:[#allocation2 + $0x38] sm:$0xff]  ;;  %v3038_v24 = vld [vmem:[#allocation5 + $0x624] ss:$16 sps:$4 sm:$0xff]  }
  0xc0   :  { %v78_v23 = vld [vmem:[#allocation2 + $0x78] sm:$0xff] }
  0xc2   :  { %1736 = vmatpush1.bf16.msra.mxu0 %v2946_v25  ;;  %1908 = vmatpush1.bf16.msra.mxu1 %v2949_v26  ;;  %v3041_v25 = vld [vmem:[#allocation5 + $0x62c] ss:$16 sps:$4 sm:$0xff]   ;;  %v3036_v26 = vld [vmem:[#allocation5 + $0x620] ss:$16 sps:$4 sm:$0xff]  }
  0xc3   :  { %1737 = vmatprep.subr.bf16.mxu0 %v2954_v27  ;;  %1909 = vmatprep.subr.bf16.mxu1 %v2957_v28  ;;  %v86_v27 = vpack.c.bf16 %v78_v23, %v70_v21  ;;  %v3039_v28 = vld [vmem:[#allocation5 + $0x628] ss:$16 sps:$4 sm:$0xff]   ;;  %v69_v21 = vld [vmem:[#allocation2 + $0x30] sm:$0xff]  ;;  %v3126_v23 = vld [vmem:[#allocation7 + $0x40] sm:$0xff]  }
  0xc6   :  { %1738 = vmatpush1.bf16.msra.mxu0 %v2952_v29  ;;  %1910 = vmatpush1.bf16.msra.mxu1 %v2955_v30  ;;  %v3044_v29 = vld [vmem:[#allocation5 + $0x644] ss:$16 sps:$4 sm:$0xff]   ;;  %v3047_v30 = vld [vmem:[#allocation5 + $0x64c] ss:$16 sps:$4 sm:$0xff]  }
  0xc7   :  { %1739 = vmatprep.subr.bf16.mxu0 %v2960_v31  ;;  %1911 = vmatprep.subr.bf16.mxu1 %v2963_v32  ;;  %v3042_v31 = vld [vmem:[#allocation5 + $0x640] ss:$16 sps:$4 sm:$0xff]   ;;  %v3045_v32 = vld [vmem:[#allocation5 + $0x648] ss:$16 sps:$4 sm:$0xff]  }
  0xca   :  { %1740 = vmatpush1.bf16.msra.mxu0 %v2958_v33  ;;  %1912 = vmatpush1.bf16.msra.mxu1 %v2961_v34  ;;  %v3050_v33 = vld [vmem:[#allocation5 + $0x664] ss:$16 sps:$4 sm:$0xff]   ;;  %v3053_v34 = vld [vmem:[#allocation5 + $0x66c] ss:$16 sps:$4 sm:$0xff]  }
  0xcb   :  { %1741 = vmatprep.subr.bf16.mxu0 %v2966_v35  ;;  %1913 = vmatprep.subr.bf16.mxu1 %v2969_v36  ;;  %v3048_v35 = vld [vmem:[#allocation5 + $0x660] ss:$16 sps:$4 sm:$0xff]   ;;  %v3051_v36 = vld [vmem:[#allocation5 + $0x668] ss:$16 sps:$4 sm:$0xff]  }
  0xce   :  { %1742 = vmatpush1.bf16.msra.mxu0 %v2964_v37  ;;  %1914 = vmatpush1.bf16.msra.mxu1 %v2967_v38  ;;  %v3056_v37 = vld [vmem:[#allocation5 + $0x684] ss:$16 sps:$4 sm:$0xff]   ;;  %v3059_v38 = vld [vmem:[#allocation5 + $0x68c] ss:$16 sps:$4 sm:$0xff]  }
  0xcf   :  { %1743 = vmatprep.subr.bf16.mxu0 %v2972_v39  ;;  %1915 = vmatprep.subr.bf16.mxu1 %v2975_v40  ;;  %v3054_v39 = vld [vmem:[#allocation5 + $0x680] ss:$16 sps:$4 sm:$0xff]   ;;  %v3057_v40 = vld [vmem:[#allocation5 + $0x688] ss:$16 sps:$4 sm:$0xff]  }
  0xd2   :  { %1744 = vmatpush1.bf16.msra.mxu0 %v2970_v41  ;;  %1916 = vmatpush1.bf16.msra.mxu1 %v2973_v42  ;;  %v3062_v41 = vld [vmem:[#allocation5 + $0x6a4] ss:$16 sps:$4 sm:$0xff]   ;;  %v3065_v42 = vld [vmem:[#allocation5 + $0x6ac] ss:$16 sps:$4 sm:$0xff]  }
  0xd3   :  { %1745 = vmatprep.subr.bf16.mxu0 %v2978_v43  ;;  %1917 = vmatprep.subr.bf16.mxu1 %v2981_v44  ;;  %v3060_v43 = vld [vmem:[#allocation5 + $0x6a0] ss:$16 sps:$4 sm:$0xff]   ;;  %v3063_v44 = vld [vmem:[#allocation5 + $0x6a8] ss:$16 sps:$4 sm:$0xff]  }
  0xd6   :  { %1746 = vmatpush1.bf16.msra.mxu0 %v2976_v45  ;;  %1918 = vmatpush1.bf16.msra.mxu1 %v2979_v46  ;;  %v3068_v45 = vld [vmem:[#allocation5 + $0x6c4] ss:$16 sps:$4 sm:$0xff]   ;;  %v3071_v46 = vld [vmem:[#allocation5 + $0x6cc] ss:$16 sps:$4 sm:$0xff]  }
  0xd7   :  { %1747 = vmatprep.subr.bf16.mxu0 %v2984_v47  ;;  %1919 = vmatprep.subr.bf16.mxu1 %v2987_v48  ;;  %v3066_v47 = vld [vmem:[#allocation5 + $0x6c0] ss:$16 sps:$4 sm:$0xff]   ;;  %v3069_v48 = vld [vmem:[#allocation5 + $0x6c8] ss:$16 sps:$4 sm:$0xff]  }
  0xda   :  { %1748 = vmatpush1.bf16.msra.mxu0 %v2982_v49  ;;  %1920 = vmatpush1.bf16.msra.mxu1 %v2985_v50  ;;  %v3074_v49 = vld [vmem:[#allocation5 + $0x6e4] ss:$16 sps:$4 sm:$0xff]   ;;  %v3077_v50 = vld [vmem:[#allocation5 + $0x6ec] ss:$16 sps:$4 sm:$0xff]  }
  0xdb   :  { %1749 = vmatprep.subr.bf16.mxu0 %v2990_v51  ;;  %1921 = vmatprep.subr.bf16.mxu1 %v2993_v52  ;;  %v3072_v51 = vld [vmem:[#allocation5 + $0x6e0] ss:$16 sps:$4 sm:$0xff]   ;;  %v3075_v52 = vld [vmem:[#allocation5 + $0x6e8] ss:$16 sps:$4 sm:$0xff]  }
  0xde   :  { %1750 = vmatpush1.bf16.msra.mxu0 %v2988_v53  ;;  %1922 = vmatpush1.bf16.msra.mxu1 %v2991_v54  ;;  %v3080_v53 = vld [vmem:[#allocation5 + $0x704] ss:$16 sps:$4 sm:$0xff]   ;;  %v3083_v54 = vld [vmem:[#allocation5 + $0x70c] ss:$16 sps:$4 sm:$0xff]  }
  0xdf   :  { %1751 = vmatprep.subr.bf16.mxu0 %v2996_v55  ;;  %1923 = vmatprep.subr.bf16.mxu1 %v2999_v56  ;;  %v3078_v55 = vld [vmem:[#allocation5 + $0x700] ss:$16 sps:$4 sm:$0xff]   ;;  %v3081_v56 = vld [vmem:[#allocation5 + $0x708] ss:$16 sps:$4 sm:$0xff]  }
  0xe2   :  { %1752 = vmatpush1.bf16.msra.mxu0 %v2994_v57  ;;  %1924 = vmatpush1.bf16.msra.mxu1 %v2997_v58  ;;  %v3086_v57 = vld [vmem:[#allocation5 + $0x724] ss:$16 sps:$4 sm:$0xff]   ;;  %v3089_v58 = vld [vmem:[#allocation5 + $0x72c] ss:$16 sps:$4 sm:$0xff]  }
  0xe3   :  { %1753 = vmatprep.subr.bf16.mxu0 %v3002_v59  ;;  %1925 = vmatprep.subr.bf16.mxu1 %v3005_v60  ;;  %v3084_v59 = vld [vmem:[#allocation5 + $0x720] ss:$16 sps:$4 sm:$0xff]   ;;  %v3087_v60 = vld [vmem:[#allocation5 + $0x728] ss:$16 sps:$4 sm:$0xff]  }
  0xe6   :  { %1754 = vmatpush1.bf16.msra.mxu0 %v3000_v61  ;;  %1926 = vmatpush1.bf16.msra.mxu1 %v3003_v62  ;;  %v3092_v61 = vld [vmem:[#allocation5 + $0x744] ss:$16 sps:$4 sm:$0xff]   ;;  %v3095_v62 = vld [vmem:[#allocation5 + $0x74c] ss:$16 sps:$4 sm:$0xff]  }
  0xe7   :  { %1755 = vmatprep.subr.bf16.mxu0 %v3008_v63  ;;  %1927 = vmatprep.subr.bf16.mxu1 %v3011_v0  ;;  %v3090_v63 = vld [vmem:[#allocation5 + $0x740] ss:$16 sps:$4 sm:$0xff]   ;;  %v3093_v0 = vld [vmem:[#allocation5 + $0x748] ss:$16 sps:$4 sm:$0xff]  }
  0xea   :  { %1756 = vmatpush1.bf16.msra.mxu0 %v3006_v1  ;;  %1928 = vmatpush1.bf16.msra.mxu1 %v3009_v2  ;;  %v3098_v1 = vld [vmem:[#allocation5 + $0x764] ss:$16 sps:$4 sm:$0xff]   ;;  %v3101_v2 = vld [vmem:[#allocation5 + $0x76c] ss:$16 sps:$4 sm:$0xff]  }
  0xeb   :  { %1757 = vmatprep.subr.bf16.mxu0 %v3014_v3  ;;  %1929 = vmatprep.subr.bf16.mxu1 %v3017_v4  ;;  %v3096_v3 = vld [vmem:[#allocation5 + $0x760] ss:$16 sps:$4 sm:$0xff]   ;;  %v3099_v4 = vld [vmem:[#allocation5 + $0x768] ss:$16 sps:$4 sm:$0xff]  }
  0xee   :  { %1758 = vmatpush1.bf16.msra.mxu0 %v3012_v5  ;;  %1930 = vmatpush1.bf16.msra.mxu1 %v3015_v6  ;;  %v3104_v5 = vld [vmem:[#allocation5 + $0x784] ss:$16 sps:$4 sm:$0xff]   ;;  %v3107_v6 = vld [vmem:[#allocation5 + $0x78c] ss:$16 sps:$4 sm:$0xff]  }
  0xef   :  { %1759 = vmatprep.subr.bf16.mxu0 %v3020_v7  ;;  %1931 = vmatprep.subr.bf16.mxu1 %v3023_v8  ;;  %v3102_v7 = vld [vmem:[#allocation5 + $0x780] ss:$16 sps:$4 sm:$0xff]   ;;  %v3105_v8 = vld [vmem:[#allocation5 + $0x788] ss:$16 sps:$4 sm:$0xff]  }
  0xf2   :  { %1760 = vmatpush1.bf16.msra.mxu0 %v3018_v9  ;;  %1932 = vmatpush1.bf16.msra.mxu1 %v3021_v10  ;;  %v3110_v9 = vld [vmem:[#allocation5 + $0x7a4] ss:$16 sps:$4 sm:$0xff]   ;;  %v3113_v10 = vld [vmem:[#allocation5 + $0x7ac] ss:$16 sps:$4 sm:$0xff]  }
  0xf3   :  { %1761 = vmatprep.subr.bf16.mxu0 %v3026_v11  ;;  %1933 = vmatprep.subr.bf16.mxu1 %v3029_v12  ;;  %v3108_v11 = vld [vmem:[#allocation5 + $0x7a0] ss:$16 sps:$4 sm:$0xff]   ;;  %v3111_v12 = vld [vmem:[#allocation5 + $0x7a8] ss:$16 sps:$4 sm:$0xff]  }
  0xf6   :  { %1762 = vmatpush1.bf16.msra.mxu0 %v3024_v13  ;;  %1934 = vmatpush1.bf16.msra.mxu1 %v3027_v14  ;;  %v3116_v13 = vld [vmem:[#allocation5 + $0x7c4] ss:$16 sps:$4 sm:$0xff]   ;;  %v3119_v14 = vld [vmem:[#allocation5 + $0x7cc] ss:$16 sps:$4 sm:$0xff]  }
  0xf7   :  { %1774 = vmatprep.subr.bf16.mxu0 %v3032_v15  ;;  %1946 = vmatprep.subr.bf16.mxu1 %v3035_v18  ;;  %v3114_v15 = vld [vmem:[#allocation5 + $0x7c0] ss:$16 sps:$4 sm:$0xff]   ;;  %v3125_v18 = vld [vmem:[#allocation5 + $0x7ec] ss:$16 sps:$4 sm:$0xff]  }
  0xf9   :  { %1764 = vmatmul.mubr.bf16.vlgmr.msra.gmra.mrb[0].mxu0 %v83_v22  ;;  %1936 = vmatmul.mubr.bf16.vlgmr.msra.gmra.mrb[0].mxu1 %v83_v22  ;;  %v77_v22 = vld [vmem:[#allocation2 + $0x70] sm:$0xff] }
  0xfa   :  { %1775 = vmatpush1.bf16.msra.mxu0 %v3030_v19  ;;  %1947 = vmatpush1.bf16.msra.mxu1 %v3033_v20  ;;  %v3120_v19 = vld [vmem:[#allocation5 + $0x7e0] ss:$16 sps:$4 sm:$0xff]   ;;  %v3123_v20 = vld [vmem:[#allocation5 + $0x7e8] ss:$16 sps:$4 sm:$0xff]  }
  0xfb   :  { %1776 = vmatprep.subr.bf16.mxu0 %v3038_v24  ;;  %1948 = vmatprep.subr.bf16.mxu1 %v3041_v25  ;;  %v3127_v24 = vld [vmem:[#allocation7 + $0xc0] sm:$0xff]   ;;  %v85_v25 = vpack.c.bf16 %v77_v22, %v69_v21 }
  0xfc   :  { %1806 = vmatprep.mubr.bf16.mxu0 %v86_v27  ;;  %1978 = vmatprep.mubr.bf16.mxu1 %v86_v27  ;;  %v3129_v27 = vld [vmem:[#allocation7 + $0x80] sm:$0xff]  }
  0xfe   :  { %1777 = vmatpush1.bf16.msra.mxu0 %v3036_v26  ;;  %1949 = vmatpush1.bf16.msra.mxu1 %v3039_v28  ;;  %v3128_v26 = vld [vmem:[#allocation7] sm:$0xff]   ;;  %v3130_v28 = vld [vmem:[#allocation7 + $0x48] sm:$0xff]  }
  0xff   :  { %1778 = vmatprep.subr.bf16.mxu0 %v3044_v29  ;;  %1950 = vmatprep.subr.bf16.mxu1 %v3047_v30  ;;  %v3131_v29 = vld [vmem:[#allocation7 + $0xc8] sm:$0xff]  }
 0x100   :  { %v3132_v30 = vld [vmem:[#allocation7 + $0x8] sm:$0xff]  }
 0x102   :  { %1779 = vmatpush1.bf16.msra.mxu0 %v3042_v31  ;;  %1951 = vmatpush1.bf16.msra.mxu1 %v3045_v32  ;;  %v3133_v31 = vld [vmem:[#allocation7 + $0x88] sm:$0xff]   ;;  %v3134_v32 = vld [vmem:[#allocation7 + $0x50] sm:$0xff]  }
 0x103   :  { %1780 = vmatprep.subr.bf16.mxu0 %v3050_v33  ;;  %1952 = vmatprep.subr.bf16.mxu1 %v3053_v34  ;;  %v3135_v33 = vld [vmem:[#allocation7 + $0xd0] sm:$0xff]  }
 0x104   :  { %v3136_v34 = vld [vmem:[#allocation7 + $0x10] sm:$0xff]  }
 0x106   :  { %1781 = vmatpush1.bf16.msra.mxu0 %v3048_v35  ;;  %1953 = vmatpush1.bf16.msra.mxu1 %v3051_v36  ;;  %v3137_v35 = vld [vmem:[#allocation7 + $0x90] sm:$0xff]   ;;  %v3138_v36 = vld [vmem:[#allocation7 + $0x58] sm:$0xff]  }
 0x107   :  { %1782 = vmatprep.subr.bf16.mxu0 %v3056_v37  ;;  %1954 = vmatprep.subr.bf16.mxu1 %v3059_v38  ;;  %v3139_v37 = vld [vmem:[#allocation7 + $0xd8] sm:$0xff]  }
 0x108   :  { %v3140_v38 = vld [vmem:[#allocation7 + $0x18] sm:$0xff]  }
 0x10a   :  { %1783 = vmatpush1.bf16.msra.mxu0 %v3054_v39  ;;  %1955 = vmatpush1.bf16.msra.mxu1 %v3057_v40  ;;  %v3141_v39 = vld [vmem:[#allocation7 + $0x98] sm:$0xff]   ;;  %v3142_v40 = vld [vmem:[#allocation7 + $0x60] sm:$0xff]  }
 0x10b   :  { %1784 = vmatprep.subr.bf16.mxu0 %v3062_v41  ;;  %1956 = vmatprep.subr.bf16.mxu1 %v3065_v42  ;;  %v3143_v41 = vld [vmem:[#allocation7 + $0xe0] sm:$0xff]  }
 0x10c   :  { %v3144_v42 = vld [vmem:[#allocation7 + $0x20] sm:$0xff]  }
 0x10e   :  { %1785 = vmatpush1.bf16.msra.mxu0 %v3060_v43  ;;  %1957 = vmatpush1.bf16.msra.mxu1 %v3063_v44  ;;  %v3145_v43 = vld [vmem:[#allocation7 + $0xa0] sm:$0xff]   ;;  %v3146_v44 = vld [vmem:[#allocation7 + $0x68] sm:$0xff]  }
 0x10f   :  { %1786 = vmatprep.subr.bf16.mxu0 %v3068_v45  ;;  %1958 = vmatprep.subr.bf16.mxu1 %v3071_v46  ;;  %v3147_v45 = vld [vmem:[#allocation7 + $0xe8] sm:$0xff]  }
 0x110   :  { %v3148_v46 = vld [vmem:[#allocation7 + $0x28] sm:$0xff]  }
 0x112   :  { %1787 = vmatpush1.bf16.msra.mxu0 %v3066_v47  ;;  %1959 = vmatpush1.bf16.msra.mxu1 %v3069_v48  ;;  %v3149_v47 = vld [vmem:[#allocation7 + $0xa8] sm:$0xff]   ;;  %v3150_v48 = vld [vmem:[#allocation7 + $0x70] sm:$0xff]  }
 0x113   :  { %1788 = vmatprep.subr.bf16.mxu0 %v3074_v49  ;;  %1960 = vmatprep.subr.bf16.mxu1 %v3077_v50  ;;  %v3151_v49 = vld [vmem:[#allocation7 + $0xf0] sm:$0xff]  }
 0x114   :  { %v3152_v50 = vld [vmem:[#allocation7 + $0x30] sm:$0xff]  }
 0x116   :  { %1789 = vmatpush1.bf16.msra.mxu0 %v3072_v51  ;;  %1961 = vmatpush1.bf16.msra.mxu1 %v3075_v52  ;;  %v3153_v51 = vld [vmem:[#allocation7 + $0xb0] sm:$0xff]   ;;  %v3154_v52 = vld [vmem:[#allocation7 + $0x78] sm:$0xff]  }
 0x117   :  { %1790 = vmatprep.subr.bf16.mxu0 %v3080_v53  ;;  %1962 = vmatprep.subr.bf16.mxu1 %v3083_v54  ;;  %v3155_v53 = vld [vmem:[#allocation7 + $0xf8] sm:$0xff]  }
 0x118   :  { %v3156_v54 = vld [vmem:[#allocation7 + $0x38] sm:$0xff]  }
 0x11a   :  { %1791 = vmatpush1.bf16.msra.mxu0 %v3078_v55  ;;  %1963 = vmatpush1.bf16.msra.mxu1 %v3081_v56  ;;  %v3157_v55 = vld [vmem:[#allocation7 + $0xb8] sm:$0xff]   ;;  %v345_v56 = vlaneseq }
 0x11b   :  { %1792 = vmatprep.subr.bf16.mxu0 %v3086_v57  ;;  %1964 = vmatprep.subr.bf16.mxu1 %v3089_v58 }
 0x11c   :  { %v346_v57 = vshrl.u32 %v345_v56, 7 }
 0x11e   :  { %1793 = vmatpush1.bf16.msra.mxu0 %v3084_v59  ;;  %1965 = vmatpush1.bf16.msra.mxu1 %v3087_v60  ;;  %v347_v58 = vsub.s32 0, %v346_v57  ;;  %v355_v59 = vsub.s32 2, %v346_v57  ;;  %v343_v60 = vld [vmem:[%s3349_s2] sm:$0xf] }
 0x11f   :  { %1794 = vmatprep.subr.bf16.mxu0 %v3092_v61  ;;  %1966 = vmatprep.subr.bf16.mxu1 %v3095_v62  ;;  %v351_v61 = vsub.s32 1, %v346_v57  ;;  %v359_v62 = vsub.s32 3, %v346_v57 }
 0x122   :  { %1795 = vmatpush1.bf16.msra.mxu0 %v3090_v63  ;;  %1967 = vmatpush1.bf16.msra.mxu1 %v3093_v0  ;;  %v348_v63 = vrot.slane %v343_v60, %v347_v58  ;;  %v356_v0 = vrot.slane %v343_v60, %v355_v59 }
 0x123   :  { %1796 = vmatprep.subr.bf16.mxu0 %v3098_v1  ;;  %1968 = vmatprep.subr.bf16.mxu1 %v3101_v2  ;;  %v352_v1 = vrot.slane %v343_v60, %v351_v61  ;;  %v360_v2 = vrot.slane %v343_v60, %v359_v62 }
 0x126   :  { %1797 = vmatpush1.bf16.msra.mxu0 %v3096_v3  ;;  %1969 = vmatpush1.bf16.msra.mxu1 %v3099_v4 }
 0x127   :  { %1798 = vmatprep.subr.bf16.mxu0 %v3104_v5  ;;  %1970 = vmatprep.subr.bf16.mxu1 %v3107_v6 }
 0x12a   :  { %1799 = vmatpush1.bf16.msra.mxu0 %v3102_v7  ;;  %1971 = vmatpush1.bf16.msra.mxu1 %v3105_v8 }
 0x12b   :  { %1800 = vmatprep.subr.bf16.mxu0 %v3110_v9  ;;  %1972 = vmatprep.subr.bf16.mxu1 %v3113_v10 }
 0x12e   :  { %1801 = vmatpush1.bf16.msra.mxu0 %v3108_v11  ;;  %1973 = vmatpush1.bf16.msra.mxu1 %v3111_v12 }
 0x12f   :  { %1802 = vmatprep.subr.bf16.mxu0 %v3116_v13  ;;  %1974 = vmatprep.subr.bf16.mxu1 %v3119_v14 }
 0x132   :  { %1803 = vmatpush1.bf16.msra.mxu0 %v3114_v15  ;;  %1975 = vmatpush1.bf16.msra.mxu1 %v3117_v16 }
 0x133   :  { %1804 = vmatprep.subr.bf16.mxu0 %v3122_v17  ;;  %1976 = vmatprep.subr.bf16.mxu1 %v3125_v18 }
 0x136   :  { %1805 = vmatpush1.bf16.msra.mxu0 %v3120_v19  ;;  %1977 = vmatpush1.bf16.msra.mxu1 %v3123_v20 }
 0x137   :  { %2655 = vmatprep.subr.bf16.mxu0 %v3126_v23  ;;  %2677 = vmatprep.subr.bf16.mxu1 %v3127_v24 }
 0x139   :  { %1807 = vmatmul.mubr.bf16.vlgmr.msra.gmra.mrb[0].mxu0 %v85_v25  ;;  %1979 = vmatmul.mubr.bf16.vlgmr.msra.gmra.mrb[0].mxu1 %v85_v25 }
 0x13a   :  { %2656 = vmatpush3.bf16.msra.mxu0 %v3128_v26  ;;  %2678 = vmatpush3.bf16.msra.mxu1 %v3129_v27 }
 0x13b   :  { %2657 = vmatprep.subr.bf16.mxu0 %v3130_v28  ;;  %2679 = vmatprep.subr.bf16.mxu1 %v3131_v29 }
 0x13e   :  { %2658 = vmatpush3.bf16.msra.mxu0 %v3132_v30  ;;  %2680 = vmatpush3.bf16.msra.mxu1 %v3133_v31 }
 0x13f   :  { %2659 = vmatprep.subr.bf16.mxu0 %v3134_v32  ;;  %2681 = vmatprep.subr.bf16.mxu1 %v3135_v33  ;;  %v2622_v33 = vld [vmem:[%s3351_s4] ss:$0 sm:$0xff]  ;;  %s3224_s4 = scalar_lea.vmem %s2354_s10, 256 }
 0x140   :  { %p3225_p10 = scmp.ne.s32.totalorder %s2354_s10, %s3224_s4  ;;  %p3230_p12 = scmp.lt.s32.totalorder %s3224_s4, %s3224_s4 }
 0x142   :  { %2660 = vmatpush3.bf16.msra.mxu0 %v3136_v34  ;;  %2682 = vmatpush3.bf16.msra.mxu1 %v3137_v35  ;;  %p3231_p13 = por %p3230_p12, %p3229_p11 }
 0x143   :  { %2661 = vmatprep.subr.bf16.mxu0 %v3138_v36  ;;  %2683 = vmatprep.subr.bf16.mxu1 %v3139_v37 }
 0x144   :  { %p3232_p0 = pnand %p3231_p13, %p3225_p10 }
 0x146   :  { %2662 = vmatpush3.bf16.msra.mxu0 %v3140_v38  ;;  %2684 = vmatpush3.bf16.msra.mxu1 %v3141_v39 }
 0x147   :  { %2663 = vmatprep.subr.bf16.mxu0 %v3142_v40  ;;  %2685 = vmatprep.subr.bf16.mxu1 %v3143_v41 }
 0x14a   :  { %2664 = vmatpush3.bf16.msra.mxu0 %v3144_v42  ;;  %2686 = vmatpush3.bf16.msra.mxu1 %v3145_v43 }
 0x14b   :  { %2665 = vmatprep.subr.bf16.mxu0 %v3146_v44  ;;  %2687 = vmatprep.subr.bf16.mxu1 %v3147_v45 }
 0x14e   :  { %2666 = vmatpush3.bf16.msra.mxu0 %v3148_v46  ;;  %2688 = vmatpush3.bf16.msra.mxu1 %v3149_v47 }
 0x14f   :  { %2667 = vmatprep.subr.bf16.mxu0 %v3150_v48  ;;  %2689 = vmatprep.subr.bf16.mxu1 %v3151_v49 }
 0x152   :  { %2668 = vmatpush3.bf16.msra.mxu0 %v3152_v50  ;;  %2690 = vmatpush3.bf16.msra.mxu1 %v3153_v51 }
 0x153   :  { %2669 = vmatprep.subr.bf16.mxu0 %v3154_v52  ;;  %2691 = vmatprep.subr.bf16.mxu1 %v3155_v53 }
 0x156   :  { %2670 = vmatpush3.bf16.msra.mxu0 %v3156_v54  ;;  %2692 = vmatpush3.bf16.msra.mxu1 %v3157_v55 }
 0x20c   :  { %v1808_v3 = vpop.f32.mrb[0].mxu0  ;;  %v1980_v4 = vpop.f32.mrb[0].mxu1 }
 0x20d   :  { %v2699_v5 = vadd.f32 %v1808_v3, %v348_v63  ;;  %v2703_v6 = vadd.f32 %v1980_v4, %v356_v0  ;;  %v1810_v7 = vpop.f32.mrb[1].mxu0  ;;  %v1982_v8 = vpop.f32.mrb[1].mxu1 }
 0x20e   :  { %v2700_v9 = vadd.f32 %v1810_v7, %v352_v1  ;;  %v2704_v10 = vadd.f32 %v1982_v8, %v360_v2  ;;  %v1812_v11 = vpop.f32.mrb[2].mxu0  ;;  %v1984_v12 = vpop.f32.mrb[2].mxu1 }
 0x20f   :  { %v2701_v13 = vadd.f32 %v1812_v11, %v348_v63  ;;  %v2705_v14 = vadd.f32 %v1984_v12, %v356_v0  ;;  %v1814_v15 = vpop.f32.mrb[3].mxu0  ;;  %v1986_v16 = vpop.f32.mrb[3].mxu1  ;;  %v1989_v19 = vmax.f32 %v2699_v5, 0.0  ;;  %v1991_v20 = vmax.f32 %v2703_v6, 0.0 }
 0x210   :  { %v2702_v17 = vadd.f32 %v1814_v15, %v352_v1  ;;  %v2706_v18 = vadd.f32 %v1986_v16, %v360_v2  ;;  %v1990_v23 = vmax.f32 %v2700_v9, 0.0  ;;  %v1992_v24 = vmax.f32 %v2704_v10, 0.0 }
 0x211   :  { %v1993_v21 = vmax.f32 %v2701_v13, 0.0  ;;  %v1995_v22 = vmax.f32 %v2705_v14, 0.0 }
 0x212   :  { %v1994_v25 = vmax.f32 %v2702_v17, 0.0  ;;  %v1996_v26 = vmax.f32 %v2706_v18, 0.0 }
 0x213   :  { %v1997_v27 = vpack.c.bf16 %v1993_v21, %v1989_v19  ;;  %v1999_v28 = vpack.c.bf16 %v1995_v22, %v1991_v20 }
 0x214   :  { %v1998_v29 = vpack.c.bf16 %v1994_v25, %v1990_v23  ;;  %v2000_v30 = vpack.c.bf16 %v1996_v26, %v1992_v24 }
 0x216   :  { %2296 = vmatprep.mubr.bf16.mxu0 %v1998_v29  ;;  %2337 = vmatprep.mubr.bf16.mxu1 %v2000_v30 }
 0x217   :  { %2297 = vmatmul.mubr.bf16.vlgmr.msra.gmra.mrb[4].mxu0 %v1997_v27  ;;  %2338 = vmatmul.mubr.bf16.vlgmr.msra.gmra.mrb[4].mxu1 %v1999_v28 }
 0x2ea   :  { %v2671_v31 = vpop.f32.mrb[4].mxu0  ;;  %v2693_v32 = vpop.f32.mrb[4].mxu1 }
 0x2eb   :  { %v2672_v34 = vpop.f32.mrb[5].mxu0  ;;  %v2694_v35 = vpop.f32.mrb[5].mxu1 }
 0x2ec   :  { %v2673_v36 = vadd.f32 %v2672_v34, %v2671_v31  ;;  %v2695_v37 = vadd.f32 %v2694_v35, %v2693_v32  ;;  %v2674_v38 = vpop.f32.mrb[6].mxu0  ;;  %v2696_v39 = vpop.f32.mrb[6].mxu1 }
 0x2ed   :  { %v2675_v40 = vpop.f32.mrb[7].mxu0  ;;  %v2697_v41 = vpop.f32.mrb[7].mxu1 }
 0x2ee   :  { %v2299_v42 = vadd.f32 %v2673_v36, %v2622_v33  ;;  %v2676_v43 = vadd.f32 %v2675_v40, %v2674_v38  ;;  %v2698_v44 = vadd.f32 %v2697_v41, %v2696_v39 }
 0x2f0   :  { %v2340_v45 = vadd.f32 %v2695_v37, %v2299_v42  ;;  %v2302_v46 = vadd.f32 %v2676_v43, %v2622_v33 }
 0x2f2   :  { %2346 = vst [vmem:[#allocation8] sm:$0xff] %v2340_v45  ;;  %v2343_v47 = vadd.f32 %v2698_v44, %v2302_v46 }
 0x2f4   :  { %2347 = vst [vmem:[#allocation8 + $0x8] sm:$0xff] %v2343_v47 }
 0x2f5   :  { %3235 = shalt.err (!%p3232_p0)
}
 0x2f6   :  { %s3236_s13 = scalar_lea.hbm %s3352_s5, 256 }
 0x2f7   :  { %p3237_p1 = scmp.ne.s32.totalorder %s3352_s5, %s3236_s13  ;;  %p3240_p2 = scmp.lt.u32.totalorder %s3236_s13, %s3352_s5 }
 0x2f9   :  { %p3242_p3 = pnand %p3240_p2, %p3237_p1 }
 0x2fb   :  { %3245 = shalt.err (!%p3242_p3)
}
 0x2fc   :  { %s3261_s17 = smov 128   ;;  %s3262_s18 = smov 8  }
 0x2fd   :  { %2359 = dma.vmem_to_hbm [thread:$0]  %s2354_s10, 256, %s3352_s5, [#allocation4], %s3261_s17, %s3261_s17, %s3262_s18  }
 0x2fe   :  { %3250 = dma.done.wait [#allocation4], 256  }
 0x2ff   :  { %3251 = vsyncadd [#allocation4], 4294967040 }
 0x300   :  { %2363 = vsyncpa [#allocation3], 1 }
 0x301   :  { %2364 = vsyncpa [#allocation6], 1 }
 0x302   :  { %2365 = vsyncpa [#allocation4], 1 }

</bundles_post_ra>
